<compile_context>
chip_gen: v6e
topology: v6e:2x2x1
jax: 0.10.0
libtpu: 0.0.40
codegen_flags: <defaults>
</compile_context>

<pallas_src>
import functools

import jax
import jax.numpy as jnp
from jax.experimental import pallas as pl
from jax.experimental.pallas import tpu as pltpu


def _cvae_kernel(xc_ref, eps_ref,
                 w1_ref, wmlv_ref, w3z_ref, w3c_ref, w4_ref, b_ref,
                 xrec_ref, mulv_ref):
    """One batch tile of the CVAE forward in (feature, batch) layout.

    xc_ref   : (input+cond, TB)  bf16   -- [x ; c] stacked along features
    eps_ref  : (latent, TB)      f32
    w1_ref   : (hidden, input+cond)     bf16  (native PyTorch (out,in) layout)
    wmlv_ref : (2*latent, hidden)       bf16  (fc_mu | fc_logvar stacked)
    w3z_ref  : (hidden, latent)         bf16
    w3c_ref  : (hidden, cond)           bf16
    w4_ref   : (input, hidden)          bf16
    b_ref    : (hidden + 2*latent + hidden + input, 1) f32  (all biases packed)
    xrec_ref : (input, TB)       f32
    mulv_ref : (2*latent, TB)    f32    -- packed [mu ; logvar]
    """
    latent = eps_ref.shape[0]
    hidden = w1_ref.shape[0]
    input_dim = w4_ref.shape[0]

    xc = xc_ref[...]                      # (input+cond, TB) bf16
    eps = eps_ref[...]                    # (latent, TB)     f32

    b = b_ref[...]                        # (total, 1) f32
    b1 = b[:hidden]
    bmlv = b[hidden:hidden + 2 * latent]
    b3 = b[hidden + 2 * latent:2 * hidden + 2 * latent]
    b4 = b[2 * hidden + 2 * latent:]

    # ----- encode: h = relu(W1 @ [x; c] + b1) -----
    h = jnp.dot(w1_ref[...], xc, preferred_element_type=jnp.float32) + b1
    h = jnp.maximum(h, 0.0)

    # ----- fused mu|logvar projection: one (2*latent, hidden) matmul -----
    mulv = (jnp.dot(wmlv_ref[...], h.astype(jnp.bfloat16),
                    preferred_element_type=jnp.float32) + bmlv)
    mu = mulv[:latent]
    logvar = mulv[latent:]

    # ----- reparameterize (f32): z = mu + eps * exp(0.5 * logvar) -----
    z = mu + eps * jnp.exp(0.5 * logvar)

    # ----- decode: x_recon = W4 @ relu(W3z @ z + W3c @ c + b3) + b4 -----
    c = xc[input_dim:]                    # (cond, TB) bf16, static sublane slice
    h2 = (jnp.dot(w3z_ref[...], z.astype(jnp.bfloat16),
                  preferred_element_type=jnp.float32)
          + jnp.dot(w3c_ref[...], c, preferred_element_type=jnp.float32)
          + b3)
    h2 = jnp.maximum(h2, 0.0)
    xrec = (jnp.dot(w4_ref[...], h2.astype(jnp.bfloat16),
                    preferred_element_type=jnp.float32) + b4)

    xrec_ref[...] = xrec.astype(xrec_ref.dtype)
    mulv_ref[...] = mulv.astype(mulv_ref.dtype)


def prepare_cvae_params(params, input_dim, latent_dim,
                        compute_dtype=jnp.bfloat16):
    """One-time conversion of PyTorch-layout params to kernel layout.

    Weights keep their native (out, in) layout (no transposes); matmul
    operands are cast to bf16 once; all biases are packed into a single
    (total, 1) f32 vector.
    """
    w3 = params["fc3_w"]                                 # (hidden, latent+cond)
    return {
        "w1": params["fc1_w"].astype(compute_dtype),     # (hidden, input+cond)
        "wmlv": jnp.concatenate(
            [params["fc_mu_w"], params["fc_logvar_w"]],
            axis=0).astype(compute_dtype),               # (2*latent, hidden)
        "w3z": w3[:, :latent_dim].astype(compute_dtype),  # (hidden, latent)
        "w3c": w3[:, latent_dim:].astype(compute_dtype),  # (hidden, cond)
        "w4": params["fc4_w"].astype(compute_dtype),      # (input, hidden)
        "b_all": jnp.concatenate(
            [params["fc1_b"], params["fc_mu_b"], params["fc_logvar_b"],
             params["fc3_b"], params["fc4_b"]]
        ).reshape(-1, 1).astype(jnp.float32),
    }


@functools.partial(jax.jit, static_argnames=("tile_batch",))
def conditional_vae_forward(x, c, eps, kp, *, tile_batch=4096):
    """CVAE forward.  x:[B,input], c:[B,cond], eps:[B,latent] (f32).

    Returns (x_recon, mu, logvar) as f32 [B, ...] arrays, matching the
    PyTorch forward (eps supplied externally instead of torch.randn_like
    for determinism).
    """
    B, input_dim = x.shape
    cond_dim = c.shape[1]
    latent_dim = eps.shape[1]
    hidden_dim = kp["w1"].shape[0]
    compute_dtype = kp["w1"].dtype

    # (feature, batch) layout: lane axis = batch tile -> lane-dense I/O.
    xc_t = jnp.concatenate([x, c], axis=1).astype(compute_dtype).T  # (in+cond, B)
    eps_t = eps.astype(jnp.float32).T                               # (latent, B)

    # ---- batch tile selection (lane axis): multiple of 128 when gridded,
    #      <= ceil(B/2) so v7x gets >= 2 parallel grid steps, prefer a
    #      divisor of B so no padding is needed in the common case. ----
    if B <= 256:
        TB = B
    else:
        half = (B + 1) // 2
        TB = max(128, (min(tile_batch, half) // 128) * 128)
        for cand in range(TB, 127, -128):      # prefer a divisor of B
            if B % cand == 0:
                TB = cand
                break
    Bp = ((B + TB - 1) // TB) * TB
    if Bp != B:
        pad = Bp - B
        xc_t = jnp.pad(xc_t, ((0, 0), (0, pad)))
        eps_t = jnp.pad(eps_t, ((0, 0), (0, pad)))
    grid = (Bp // TB,)

    def act_spec(rows):
        return pl.BlockSpec((rows, TB), lambda i: (0, i))

    def res_spec(a):  # full-array weight block, resident across the batch grid
        return pl.BlockSpec(a.shape, lambda i: (0, 0))

    weights = (kp["w1"], kp["wmlv"], kp["w3z"], kp["w3c"], kp["w4"],
               kp["b_all"])

    in_specs = ([act_spec(input_dim + cond_dim), act_spec(latent_dim)]
                + [res_spec(w) for w in weights])
    out_specs = (act_spec(input_dim), act_spec(2 * latent_dim))
    out_shapes = (
        jax.ShapeDtypeStruct((input_dim, Bp), jnp.float32),        # x_recon^T
        jax.ShapeDtypeStruct((2 * latent_dim, Bp), jnp.float32),   # [mu;logvar]^T
    )

    flops = 2 * Bp * (hidden_dim * (input_dim + cond_dim)
                      + 2 * latent_dim * hidden_dim
                      + hidden_dim * (latent_dim + cond_dim)
                      + input_dim * hidden_dim)
    bytes_accessed = sum(int(a.size) * a.dtype.itemsize
                         for a in (xc_t, eps_t) + weights)
    bytes_accessed += Bp * (input_dim + 2 * latent_dim) * 4
    cost = pl.CostEstimate(flops=flops,
                           transcendentals=Bp * latent_dim,
                           bytes_accessed=bytes_accessed)

    xrec_t, mulv_t = pl.pallas_call(
        _cvae_kernel,
        out_shape=out_shapes,
        grid=grid,
        in_specs=in_specs,
        out_specs=out_specs,
        compiler_params=pltpu.CompilerParams(
            dimension_semantics=("parallel",)),
        cost_estimate=cost,
    )(xc_t, eps_t, *weights)

    x_recon = xrec_t[:, :B].T
    mu = mulv_t[:latent_dim, :B].T
    logvar = mulv_t[latent_dim:, :B].T
    return x_recon, mu, logvar


# --------------------------- test utilities ---------------------------------

def _init_params(key, input_dim, cond_dim, hidden_dim, latent_dim):
    """Deterministic PyTorch-style uniform(-1/sqrt(fan_in), +1/sqrt(fan_in))."""
    def linear(key, out_f, in_f):
        kw, kb = jax.random.split(key)
        bound = 1.0 / jnp.sqrt(in_f)
        w = jax.random.uniform(kw, (out_f, in_f), jnp.float32, -bound, bound)
        b = jax.random.uniform(kb, (out_f,), jnp.float32, -bound, bound)
        return w, b

    keys = jax.random.split(key, 5)
    p = {}
    p["fc1_w"], p["fc1_b"] = linear(keys[0], hidden_dim, input_dim + cond_dim)
    p["fc_mu_w"], p["fc_mu_b"] = linear(keys[1], latent_dim, hidden_dim)
    p["fc_logvar_w"], p["fc_logvar_b"] = linear(keys[2], latent_dim, hidden_dim)
    p["fc3_w"], p["fc3_b"] = linear(keys[3], hidden_dim, latent_dim + cond_dim)
    p["fc4_w"], p["fc4_b"] = linear(keys[4], input_dim, hidden_dim)
    return p


def _reference_forward(x, c, eps, params):
    """Pure-JAX f32 reference replicating the PyTorch forward semantics."""
    xc = jnp.concatenate([x, c], axis=1)
    h = jax.nn.relu(xc @ params["fc1_w"].T + params["fc1_b"])
    mu = h @ params["fc_mu_w"].T + params["fc_mu_b"]
    logvar = h @ params["fc_logvar_w"].T + params["fc_logvar_b"]
    z = mu + eps * jnp.exp(0.5 * logvar)
    zc = jnp.concatenate([z, c], axis=1)
    h2 = jax.nn.relu(zc @ params["fc3_w"].T + params["fc3_b"])
    x_recon = h2 @ params["fc4_w"].T + params["fc4_b"]
    return x_recon, mu, logvar


def _emulated_forward(x, c, eps, kp, latent_dim):
    """Pure-JAX reference mirroring the kernel's bf16-fed matmul math."""
    bf = jnp.bfloat16
    hidden = kp["w1"].shape[0]
    b = kp["b_all"][:, 0]
    b1 = b[:hidden]
    bmlv = b[hidden:hidden + 2 * latent_dim]
    b3 = b[hidden + 2 * latent_dim:2 * hidden + 2 * latent_dim]
    b4 = b[2 * hidden + 2 * latent_dim:]

    xc = jnp.concatenate([x, c], axis=1).astype(bf)
    cb = c.astype(bf)
    h = jnp.maximum(jnp.dot(xc, kp["w1"].T,
                            preferred_element_type=jnp.float32) + b1, 0.0)
    mulv = jnp.dot(h.astype(bf), kp["wmlv"].T,
                   preferred_element_type=jnp.float32) + bmlv
    mu, logvar = mulv[:, :latent_dim], mulv[:, latent_dim:]
    z = mu + eps * jnp.exp(0.5 * logvar)
    h2 = jnp.maximum(
        jnp.dot(z.astype(bf), kp["w3z"].T, preferred_element_type=jnp.float32)
        + jnp.dot(cb, kp["w3c"].T, preferred_element_type=jnp.float32) + b3,
        0.0)
    xrec = jnp.dot(h2.astype(bf), kp["w4"].T,
                   preferred_element_type=jnp.float32) + b4
    return xrec, mu, logvar


if __name__ == "__main__":
    B, input_dim, cond_dim, hidden_dim, latent_dim = 16, 16, 16, 32, 8

    key = jax.random.PRNGKey(0)
    k_x, k_c, k_eps, k_p = jax.random.split(key, 4)

    x = jax.random.normal(k_x, (B, input_dim), jnp.float32)
    # binary-mask style condition vector
    c = (jax.random.uniform(k_c, (B, cond_dim)) > 0.5).astype(jnp.float32)
    # eps drawn outside the kernel (corresponds to torch.randn_like(std))
    # TODO(synk): in-kernel RNG (pltpu.prng_*) could replace the external eps.
    eps = jax.random.normal(k_eps, (B, latent_dim), jnp.float32)

    params = _init_params(k_p, input_dim, cond_dim, hidden_dim, latent_dim)
    kp = prepare_cvae_params(params, input_dim, latent_dim)

    # ---- small batch (single grid step, no padding) ----
    x_recon, mu, logvar = conditional_vae_forward(x, c, eps, kp)
    jax.block_until_ready((x_recon, mu, logvar))

    # Tight check vs a pure-JAX reference mirroring the kernel's bf16 matmuls.
    e_xr, e_mu, e_lv = _emulated_forward(x, c, eps, kp, latent_dim)
    assert jnp.allclose(x_recon, e_xr, atol=2e-3, rtol=2e-3)
    assert jnp.allclose(mu, e_mu, atol=2e-3, rtol=2e-3)
    assert jnp.allclose(logvar, e_lv, atol=2e-3, rtol=2e-3)

    # Loose sanity check vs the full-f32 PyTorch-semantics reference
    # (tolerance widened because matmul operands are fed in bf16).
    r_xr, r_mu, r_lv = _reference_forward(x, c, eps, params)
    assert jnp.allclose(x_recon, r_xr, atol=1e-1, rtol=1e-1)
    assert jnp.allclose(mu, r_mu, atol=1e-1, rtol=1e-1)
    assert jnp.allclose(logvar, r_lv, atol=1e-1, rtol=1e-1)

    # ---- larger batch: exercises the 2-step, 128-multiple batch grid ----
    B2 = 512
    x2 = jax.random.normal(k_x, (B2, input_dim), jnp.float32)
    c2 = (jax.random.uniform(k_c, (B2, cond_dim)) > 0.5).astype(jnp.float32)
    eps2 = jax.random.normal(k_eps, (B2, latent_dim), jnp.float32)
    xr2, mu2, lv2 = conditional_vae_forward(x2, c2, eps2, kp)
    jax.block_until_ready((xr2, mu2, lv2))
    e_xr2, e_mu2, e_lv2 = _emulated_forward(x2, c2, eps2, kp, latent_dim)
    assert jnp.allclose(xr2, e_xr2, atol=2e-3, rtol=2e-3)
    assert jnp.allclose(mu2, e_mu2, atol=2e-3, rtol=2e-3)
    assert jnp.allclose(lv2, e_lv2, atol=2e-3, rtol=2e-3)

    print("KERNEL_OK")
</pallas_src>

<mosaic_0001>
module attributes {stable_mosaic.version = 11 : i64} {
  func.func @_cvae_kernel(%arg0: i32, %arg1: memref<32x16xbf16, #tpu.memory_space<vmem>>, %arg2: memref<8x16xf32, #tpu.memory_space<vmem>>, %arg3: memref<32x32xbf16, #tpu.memory_space<vmem>>, %arg4: memref<16x32xbf16, #tpu.memory_space<vmem>>, %arg5: memref<32x8xbf16, #tpu.memory_space<vmem>>, %arg6: memref<32x16xbf16, #tpu.memory_space<vmem>>, %arg7: memref<16x32xbf16, #tpu.memory_space<vmem>>, %arg8: memref<96x1xf32, #tpu.memory_space<vmem>>, %arg9: memref<16x16xf32, #tpu.memory_space<vmem>>, %arg10: memref<16x16xf32, #tpu.memory_space<vmem>>) attributes {dimension_semantics = [#tpu.dimension_semantics<parallel>], iteration_bounds = array<i64: 1>, scalar_prefetch = 0 : i64, scratch_operands = 0 : i64, tpu.core_type = #tpu.core_type<tc>, window_params = [{transform_indices = @transform_0, window_bounds = array<i64: 32, 16>}, {transform_indices = @transform_1, window_bounds = array<i64: 8, 16>}, {pipeline_mode = #tpu.pipeline_mode<synchronous>, transform_indices = @transform_2, window_bounds = array<i64: 32, 32>}, {pipeline_mode = #tpu.pipeline_mode<synchronous>, transform_indices = @transform_3, window_bounds = array<i64: 16, 32>}, {pipeline_mode = #tpu.pipeline_mode<synchronous>, transform_indices = @transform_4, window_bounds = array<i64: 32, 8>}, {pipeline_mode = #tpu.pipeline_mode<synchronous>, transform_indices = @transform_5, window_bounds = array<i64: 32, 16>}, {pipeline_mode = #tpu.pipeline_mode<synchronous>, transform_indices = @transform_6, window_bounds = array<i64: 16, 32>}, {pipeline_mode = #tpu.pipeline_mode<synchronous>, transform_indices = @transform_7, window_bounds = array<i64: 96, 1>}, {transform_indices = @transform_8, window_bounds = array<i64: 16, 16>}, {transform_indices = @transform_9, window_bounds = array<i64: 16, 16>}]} {
    %c0 = arith.constant 0 : index
    %c0_0 = arith.constant 0 : index
    %0 = vector.load %arg1[%c0, %c0_0] : memref<32x16xbf16, #tpu.memory_space<vmem>>, vector<32x16xbf16>
    %c0_1 = arith.constant 0 : index
    %c0_2 = arith.constant 0 : index
    %1 = vector.load %arg2[%c0_1, %c0_2] : memref<8x16xf32, #tpu.memory_space<vmem>>, vector<8x16xf32>
    %c0_3 = arith.constant 0 : index
    %c0_4 = arith.constant 0 : index
    %2 = vector.load %arg8[%c0_3, %c0_4] : memref<96x1xf32, #tpu.memory_space<vmem>>, vector<96x1xf32>
    %3 = vector.extract_strided_slice %2 {offsets = [0, 0], sizes = [32, 1], strides = [1, 1]} : vector<96x1xf32> to vector<32x1xf32>
    %4 = vector.extract_strided_slice %2 {offsets = [32, 0], sizes = [16, 1], strides = [1, 1]} : vector<96x1xf32> to vector<16x1xf32>
    %5 = vector.extract_strided_slice %2 {offsets = [48, 0], sizes = [32, 1], strides = [1, 1]} : vector<96x1xf32> to vector<32x1xf32>
    %6 = vector.extract_strided_slice %2 {offsets = [80, 0], sizes = [16, 1], strides = [1, 1]} : vector<96x1xf32> to vector<16x1xf32>
    %c0_5 = arith.constant 0 : index
    %c0_6 = arith.constant 0 : index
    %7 = vector.load %arg3[%c0_5, %c0_6] : memref<32x32xbf16, #tpu.memory_space<vmem>>, vector<32x32xbf16>
    %cst = arith.constant dense<0.000000e+00> : vector<32x16xf32>
    %8 = tpu.matmul %7, %0, %cst {dimension_numbers = #tpu.dot_dimension_numbers<[1], [0], [0], [1], [0, 0, 1, 1], [], []>} : vector<32x32xbf16>, vector<32x16xbf16>, vector<32x16xf32> -> vector<32x16xf32>
    %9 = vector.broadcast %3 : vector<32x1xf32> to vector<32x16xf32>
    %10 = arith.addf %8, %9 : vector<32x16xf32>
    %cst_7 = arith.constant 0.000000e+00 : f32
    %11 = vector.broadcast %cst_7 : f32 to vector<32x16xf32>
    %12 = arith.maximumf %10, %11 : vector<32x16xf32>
    %c0_8 = arith.constant 0 : index
    %c0_9 = arith.constant 0 : index
    %13 = vector.load %arg4[%c0_8, %c0_9] : memref<16x32xbf16, #tpu.memory_space<vmem>>, vector<16x32xbf16>
    %14 = arith.truncf %12 : vector<32x16xf32> to vector<32x16xbf16>
    %cst_10 = arith.constant dense<0.000000e+00> : vector<16x16xf32>
    %15 = tpu.matmul %13, %14, %cst_10 {dimension_numbers = #tpu.dot_dimension_numbers<[1], [0], [0], [1], [0, 0, 1, 1], [], []>} : vector<16x32xbf16>, vector<32x16xbf16>, vector<16x16xf32> -> vector<16x16xf32>
    %16 = vector.broadcast %4 : vector<16x1xf32> to vector<16x16xf32>
    %17 = arith.addf %15, %16 : vector<16x16xf32>
    %18 = vector.extract_strided_slice %17 {offsets = [0, 0], sizes = [8, 16], strides = [1, 1]} : vector<16x16xf32> to vector<8x16xf32>
    %19 = vector.extract_strided_slice %17 {offsets = [8, 0], sizes = [8, 16], strides = [1, 1]} : vector<16x16xf32> to vector<8x16xf32>
    %cst_11 = arith.constant 5.000000e-01 : f32
    %20 = vector.broadcast %cst_11 : f32 to vector<8x16xf32>
    %21 = arith.mulf %20, %19 : vector<8x16xf32>
    %22 = math.exp %21 : vector<8x16xf32>
    %23 = arith.mulf %1, %22 : vector<8x16xf32>
    %24 = arith.addf %18, %23 : vector<8x16xf32>
    %25 = vector.extract_strided_slice %0 {offsets = [16, 0], sizes = [16, 16], strides = [1, 1]} : vector<32x16xbf16> to vector<16x16xbf16>
    %c0_12 = arith.constant 0 : index
    %c0_13 = arith.constant 0 : index
    %26 = vector.load %arg5[%c0_12, %c0_13] : memref<32x8xbf16, #tpu.memory_space<vmem>>, vector<32x8xbf16>
    %27 = arith.truncf %24 : vector<8x16xf32> to vector<8x16xbf16>
    %cst_14 = arith.constant dense<0.000000e+00> : vector<32x16xf32>
    %28 = tpu.matmul %26, %27, %cst_14 {dimension_numbers = #tpu.dot_dimension_numbers<[1], [0], [0], [1], [0, 0, 1, 1], [], []>} : vector<32x8xbf16>, vector<8x16xbf16>, vector<32x16xf32> -> vector<32x16xf32>
    %c0_15 = arith.constant 0 : index
    %c0_16 = arith.constant 0 : index
    %29 = vector.load %arg6[%c0_15, %c0_16] : memref<32x16xbf16, #tpu.memory_space<vmem>>, vector<32x16xbf16>
    %cst_17 = arith.constant dense<0.000000e+00> : vector<32x16xf32>
    %30 = tpu.matmul %29, %25, %cst_17 {dimension_numbers = #tpu.dot_dimension_numbers<[1], [0], [0], [1], [0, 0, 1, 1], [], []>} : vector<32x16xbf16>, vector<16x16xbf16>, vector<32x16xf32> -> vector<32x16xf32>
    %31 = arith.addf %28, %30 : vector<32x16xf32>
    %32 = vector.broadcast %5 : vector<32x1xf32> to vector<32x16xf32>
    %33 = arith.addf %31, %32 : vector<32x16xf32>
    %cst_18 = arith.constant 0.000000e+00 : f32
    %34 = vector.broadcast %cst_18 : f32 to vector<32x16xf32>
    %35 = arith.maximumf %33, %34 : vector<32x16xf32>
    %c0_19 = arith.constant 0 : index
    %c0_20 = arith.constant 0 : index
    %36 = vector.load %arg7[%c0_19, %c0_20] : memref<16x32xbf16, #tpu.memory_space<vmem>>, vector<16x32xbf16>
    %37 = arith.truncf %35 : vector<32x16xf32> to vector<32x16xbf16>
    %cst_21 = arith.constant dense<0.000000e+00> : vector<16x16xf32>
    %38 = tpu.matmul %36, %37, %cst_21 {dimension_numbers = #tpu.dot_dimension_numbers<[1], [0], [0], [1], [0, 0, 1, 1], [], []>} : vector<16x32xbf16>, vector<32x16xbf16>, vector<16x16xf32> -> vector<16x16xf32>
    %39 = vector.broadcast %6 : vector<16x1xf32> to vector<16x16xf32>
    %40 = arith.addf %38, %39 : vector<16x16xf32>
    %c0_22 = arith.constant 0 : index
    %c0_23 = arith.constant 0 : index
    %41 = vector.load %arg9[%c0_22, %c0_23] : memref<16x16xf32, #tpu.memory_space<vmem>>, vector<16x16xf32>
    tpu.vector_store %arg9[%c0_22, %c0_23], %40 {strides = array<i32>} : memref<16x16xf32, #tpu.memory_space<vmem>>, vector<16x16xf32>,
    %c0_24 = arith.constant 0 : index
    %c0_25 = arith.constant 0 : index
    %42 = vector.load %arg10[%c0_24, %c0_25] : memref<16x16xf32, #tpu.memory_space<vmem>>, vector<16x16xf32>
    tpu.vector_store %arg10[%c0_24, %c0_25], %17 {strides = array<i32>} : memref<16x16xf32, #tpu.memory_space<vmem>>, vector<16x16xf32>,
    return
  }
  func.func @transform_0(%arg0: i32) -> (i32, i32) {
    %c0_i32 = arith.constant 0 : i32
    %c0_i32_0 = arith.constant 0 : i32
    return %c0_i32, %arg0 : i32, i32
  }
  func.func @transform_1(%arg0: i32) -> (i32, i32) {
    %c0_i32 = arith.constant 0 : i32
    %c0_i32_0 = arith.constant 0 : i32
    return %c0_i32, %arg0 : i32, i32
  }
  func.func @transform_2(%arg0: i32) -> (i32, i32) {
    %c0_i32 = arith.constant 0 : i32
    %c0_i32_0 = arith.constant 0 : i32
    %c0_i32_1 = arith.constant 0 : i32
    return %c0_i32, %c0_i32_0 : i32, i32
  }
  func.func @transform_3(%arg0: i32) -> (i32, i32) {
    %c0_i32 = arith.constant 0 : i32
    %c0_i32_0 = arith.constant 0 : i32
    %c0_i32_1 = arith.constant 0 : i32
    return %c0_i32, %c0_i32_0 : i32, i32
  }
  func.func @transform_4(%arg0: i32) -> (i32, i32) {
    %c0_i32 = arith.constant 0 : i32
    %c0_i32_0 = arith.constant 0 : i32
    %c0_i32_1 = arith.constant 0 : i32
    return %c0_i32, %c0_i32_0 : i32, i32
  }
  func.func @transform_5(%arg0: i32) -> (i32, i32) {
    %c0_i32 = arith.constant 0 : i32
    %c0_i32_0 = arith.constant 0 : i32
    %c0_i32_1 = arith.constant 0 : i32
    return %c0_i32, %c0_i32_0 : i32, i32
  }
  func.func @transform_6(%arg0: i32) -> (i32, i32) {
    %c0_i32 = arith.constant 0 : i32
    %c0_i32_0 = arith.constant 0 : i32
    %c0_i32_1 = arith.constant 0 : i32
    return %c0_i32, %c0_i32_0 : i32, i32
  }
  func.func @transform_7(%arg0: i32) -> (i32, i32) {
    %c0_i32 = arith.constant 0 : i32
    %c0_i32_0 = arith.constant 0 : i32
    %c0_i32_1 = arith.constant 0 : i32
    return %c0_i32, %c0_i32_0 : i32, i32
  }
  func.func @transform_8(%arg0: i32) -> (i32, i32) {
    %c0_i32 = arith.constant 0 : i32
    %c0_i32_0 = arith.constant 0 : i32
    return %c0_i32, %arg0 : i32, i32
  }
  func.func @transform_9(%arg0: i32) -> (i32, i32) {
    %c0_i32 = arith.constant 0 : i32
    %c0_i32_0 = arith.constant 0 : i32
    return %c0_i32, %arg0 : i32, i32
  }
}

</mosaic_0001>

<bundles_post_ra>
// kernel: conditional_vae_forward.1
= control target key start
LH: loop header
LB: loop body
LE: loop exit
PB: predicated region body
PF: predicated region fallthrough
CT: control target
= control target key end

     0   :  { %v559_v1 = vmov 0   ;;  %vm95_vm0 = vcmask 261120   ;;  %v560_v17 = vmov 0.0   ;;  %vm561_vm1 = vmmov 0   ;;  %s713_s0 = inlined_call_operand.vmem [shape: bf16[32,16], index: 0, kind: input, shape index: {}]   ;;  %s714_s2 = inlined_call_operand.vmem [shape: bf16[32,32], index: 2, kind: input, shape index: {}]   ;;  %s715_s7 = inlined_call_operand.vmem [shape: f32[96,1], index: 7, kind: input, shape index: {}]   ;;  %s716_s3 = inlined_call_operand.vmem [shape: bf16[16,32], index: 3, kind: input, shape index: {}]   ;;  %s717_s5 = inlined_call_operand.vmem [shape: bf16[32,16], index: 5, kind: input, shape index: {}]   ;;  %s718_s4 = inlined_call_operand.vmem [shape: bf16[32,8], index: 4, kind: input, shape index: {}]   ;;  %s719_s9 = inlined_call_operand.vmem [shape: f32[16,16], index: 9, kind: output, shape index: {1}]   ;;  %s720_s1 = inlined_call_operand.vmem [shape: f32[8,16], index: 1, kind: input, shape index: {}]   ;;  %s721_s6 = inlined_call_operand.vmem [shape: bf16[16,32], index: 6, kind: input, shape index: {}]   ;;  %s722_s8 = inlined_call_operand.vmem [shape: f32[16,16], index: 8, kind: output, shape index: {0}]  }
   0x1   :  { %v547_v0 = vld [vmem:[%s713_s0 + $0x8] sm:$0xff]   ;;  %545 = vset.pattern.permute.xlu0 %v559_v1  ;;  %546 = vset.pattern.permute.xlu1 %v559_v1  ;;  %v548_v2 = vld [vmem:[%s713_s0] sm:$0xff]   ;;  %v39_v4 = vld [vmem:[%s715_s7 + $0x10] sm:$0xff]  ;;  %vm242_vm2 = vcmask 130048   ;;  %vm308_vm3 = vcmask 64512   ;;  %vm315_vm4 = vcmask 1043456  }
   0x2   :  { %505 = vmatprep.subr.bf16.mxu0 %v547_v0  ;;  %v549_v3 = vld [vmem:[%s714_s2] sm:$0xff]   ;;  %65 = vperm.xlu0 %545, %v39_v4   ;;  %v550_v6 = vld [vmem:[%s714_s2 + $0x8] sm:$0xff]   ;;  %v40_v7 = vld [vmem:[%s715_s7 + $0x18] sm:$0xff] }
   0x3   :  { %506 = vmatpush3.bf16.msra.mxu0 %v547_v0  ;;  %509 = vmatprep.mubr.msk.bf16.mxu0 %vm95_vm0, %v549_v3  ;;  %v37_v5 = vld [vmem:[%s715_s7] sm:$0xff]  ;;  %v38_v8 = vld [vmem:[%s715_s7 + $0x8] sm:$0xff]  ;;  %v43_v13 = vld [vmem:[%s715_s7 + $0x30] sm:$0xff] }
   0x4   :  { %507 = vmatprep.subr.bf16.mxu0 %v548_v2  ;;  %55 = vperm.xlu1 %546, %v37_v5   ;;  %v42_v9 = vld [vmem:[%s715_s7 + $0x28] sm:$0xff]  ;;  %v41_v10 = vld [vmem:[%s715_s7 + $0x20] sm:$0xff]  ;;  %v44_v14 = vld [vmem:[%s715_s7 + $0x38] sm:$0xff] }
   0x5   :  { %v45_v11 = vld [vmem:[%s715_s7 + $0x40] sm:$0xff]  ;;  %v46_v12 = vld [vmem:[%s715_s7 + $0x48] sm:$0xff]  ;;  %v47_v15 = vld [vmem:[%s715_s7 + $0x50] sm:$0xff]  ;;  %513 = vmatprep.subr.bf16.mxu1 %v560_v17  ;;  %517 = vmatprep.mubr.msk.bf16.mxu1 %vm561_vm1, %v560_v17 }
   0x6   :  { %70 = vperm.xlu0 %545, %v40_v7   ;;  %v48_v16 = vld [vmem:[%s715_s7 + $0x58] sm:$0xff]  ;;  %v551_v36 = vld [vmem:[%s716_s3] sm:$0xff]   ;;  %v553_v38 = vld [vmem:[%s717_s5 + $0x8] sm:$0xff]  }
   0x7   :  { %508 = vmatpush3.bf16.msra.mxu0 %v548_v2  ;;  %v552_v37 = vld [vmem:[%s717_s5] sm:$0xff]   ;;  %v555_v56 = vld [vmem:[%s718_s4 + $0x8] sm:$0xff]  }
   0x8   :  { %521 = vmatprep.subr.bf16.mxu0 %v547_v0  ;;  %60 = vperm.xlu1 %546, %v38_v8   ;;  %v554_v39 = vld [vmem:[%s718_s4] sm:$0xff]  }
   0x9   :  { %v36_v50 = vld [vmem:[%s720_s1] sm:$0xff] }
   0xa   :  { %510 = vmatmul.mubr.msk.bf16.vlgmr.msra.gmra.mxu0 %vm95_vm0, %v550_v6  ;;  %166 = vperm.xlu0 %545, %v42_v9  }
   0xb   :  { %522 = vmatpush3.bf16.msra.mxu0 %v547_v0  ;;  %523 = vmatprep.mubr.msk.bf16.mxu0 %vm242_vm2, %v552_v37 }
   0xc   :  { %161 = vperm.xlu1 %546, %v41_v10   ;;  %533 = vmatprep.subr.bf16.mxu0 %v560_v17 }
   0xe   :  { %380 = vperm.xlu0 %545, %v45_v11  }
  0x10   :  { %385 = vperm.xlu1 %546, %v46_v12  }
  0x12   :  { %370 = vperm.xlu0 %545, %v43_v13   ;;  %524 = vmatmul.mubr.msk.bf16.vlgmr.msra.gmra.mxu0 %vm242_vm2, %v553_v38 }
  0x13   :  { %537 = vmatprep.mubr.msk.bf16.mxu0 %vm561_vm1, %v560_v17 }
  0x14   :  { %375 = vperm.xlu1 %546, %v44_v14  }
  0x16   :  { %402 = vperm.xlu0 %545, %v47_v15  }
  0x18   :  { %407 = vperm.xlu1 %546, %v48_v16  }
  0x7d   :  { %v66_v18 = vpop.permute.xlu0 %65 }
  0x7f   :  { %v56_v19 = vpop.permute.xlu1 %55 }
  0x81   :  { %v71_v23 = vpop.permute.xlu0 %70 }
  0x83   :  { %v61_v26 = vpop.permute.xlu1 %60 }
  0x85   :  { %v167_v44 = vpop.permute.xlu0 %166 }
  0x87   :  { %v162_v40 = vpop.permute.xlu1 %161 }
  0x89   :  { %v381_v60 = vpop.permute.xlu0 %380 }
  0x8b   :  { %v386_v61 = vpop.permute.xlu1 %385 }
  0x8d   :  { %v371_v9 = vpop.permute.xlu0 %370 }
  0x8f   :  { %v376_v10 = vpop.permute.xlu1 %375 }
  0xca   :  { %v511_v20 = vpop.f32.mrf.mxu0 }
  0xcb   :  { %v145_v22 = vadd.f32 %v511_v20, %v66_v18  ;;  %v556_v20 = vld [vmem:[%s721_s6] sm:$0xff]  }
  0xcc   :  { %v136_v21 = vpop.f32.mrf.mxu0 }
  0xcd   :  { %v153_v28 = vmax.f32 %v145_v22, 0.0  ;;  %v137_v29 = vadd.f32 %v136_v21, %v56_v19  ;;  %v403_v21 = vpop.permute.xlu0 %402 }
  0xce   :  { %v512_v24 = vpop.f32.mrf.mxu0 }
  0xcf   :  { %v148_v25 = vadd.f32 %v512_v24, %v71_v23  ;;  %v151_v34 = vmax.f32 %v137_v29, 0.0 }
  0xd0   :  { %v139_v27 = vpop.f32.mrf.mxu0 }
  0xd1   :  { %v154_v30 = vmax.f32 %v148_v25, 0.0  ;;  %v140_v31 = vadd.f32 %v139_v27, %v61_v26  ;;  %v408_v25 = vpop.permute.xlu1 %407 }
  0xd2   :  { %v525_v57 = vpop.f32.mrf.mxu0 }
  0xd3   :  { %v152_v32 = vmax.f32 %v140_v31, 0.0  ;;  %v158_v33 = vpack.c.bf16 %v154_v30, %v153_v28 }
  0xd4   :  { %v283_v58 = vpop.f32.mrf.mxu0 }
  0xd5   :  { %514 = vmatpush3.bf16.msra.mxu1 %v158_v33  ;;  %v157_v35 = vpack.c.bf16 %v152_v32, %v151_v34 }
  0xd6   :  { %515 = vmatprep.subr.bf16.mxu1 %v560_v17  ;;  %v526_v63 = vpop.f32.mrf.mxu0 }
  0xd8   :  { %v286_v5 = vpop.f32.mrf.mxu0 }
  0xd9   :  { %516 = vmatpush3.bf16.msra.mxu1 %v157_v35 }
  0xdc   :  { %518 = vmatmul.mubr.msk.bf16.vlgmr.msra.gmra.mxu1 %vm95_vm0, %v551_v36 }
  0xdd   :  { %529 = vmatprep.mubr.msk.bf16.mxu1 %vm308_vm3, %v554_v39 }
 0x19c   :  { %v211_v41 = vpop.f32.mrf.mxu1 }
 0x19d   :  { %v212_v42 = vadd.f32 %v211_v41, %v162_v40 }
 0x19e   :  { %v519_v43 = vpop.f32.mrf.mxu1 }
 0x19f   :  { %461 = vst.msk [vmem:[%s719_s9] sm:$0xff] %vm242_vm2, %v212_v42 }
 0x1a0   :  { %v214_v45 = vpop.f32.mrf.mxu1 }
 0x1a1   :  { %v215_v46 = vadd.f32 %v214_v45, %v167_v44 }
 0x1a2   :  { %v520_v47 = vpop.f32.mrf.mxu1 }
 0x1a3   :  { %v218_v48 = vmul.f32 0.5, %v215_v46  ;;  %462 = vst.msk [vmem:[%s719_s9 + $0x8] sm:$0xff] %vm242_vm2, %v215_v46 }
 0x1a5   :  { %v219_v49 = vmul.f32 1.442695, %v218_v48 }
 0x1a7   :  { %557 = vpow2.f32 %v219_v49 }
 0x1b4   :  { %v558_v51 = vpop.eup %557 }
 0x1b5   :  { %v221_v52 = vmul.f32 %v558_v51, %v36_v50 }
 0x1b7   :  { %v222_v53 = vadd.f32 %v221_v52, %v212_v42 }
 0x1b9   :  { %v227_v54 = vpack.c.bf16 %v222_v53, %v222_v53 }
 0x1bb   :  { %541 = vmatprep.subr.msk.bf16.mxu1 %vm315_vm4, %v227_v54  ;;  %v317_v55 = vsel %vm315_vm4, %v227_v54, 0 }
 0x1bc   :  { %528 = vmatpush3.bf16.msra.mxu1 %v317_v55 }
 0x1bf   :  { %530 = vmatmul.mubr.msk.bf16.vlgmr.msra.gmra.mxu1 %vm308_vm3, %v555_v56 }
 0x27f   :  { %v531_v59 = vpop.f32.mrf.mxu1 }
 0x280   :  { %v362_v62 = vadd.f32 %v531_v59, %v525_v57 }
 0x281   :  { %v353_v0 = vpop.f32.mrf.mxu1 }
 0x282   :  { %v390_v2 = vadd.f32 %v381_v60, %v362_v62  ;;  %v354_v3 = vadd.f32 %v353_v0, %v283_v58 }
 0x283   :  { %v532_v1 = vpop.f32.mrf.mxu1 }
 0x284   :  { %v365_v4 = vadd.f32 %v532_v1, %v526_v63  ;;  %v394_v11 = vmax.f32 %v390_v2, 0.0  ;;  %v388_v12 = vadd.f32 %v371_v9, %v354_v3 }
 0x285   :  { %v356_v6 = vpop.f32.mrf.mxu1 }
 0x286   :  { %v391_v7 = vadd.f32 %v386_v61, %v365_v4  ;;  %v357_v8 = vadd.f32 %v356_v6, %v286_v5  ;;  %v392_v18 = vmax.f32 %v388_v12, 0.0 }
 0x288   :  { %v395_v13 = vmax.f32 %v391_v7, 0.0  ;;  %v389_v14 = vadd.f32 %v376_v10, %v357_v8 }
 0x28a   :  { %v399_v15 = vpack.c.bf16 %v395_v13, %v394_v11  ;;  %v393_v16 = vmax.f32 %v389_v14, 0.0 }
 0x28c   :  { %534 = vmatpush3.bf16.msra.mxu0 %v399_v15  ;;  %v398_v19 = vpack.c.bf16 %v393_v16, %v392_v18 }
 0x28d   :  { %535 = vmatprep.subr.bf16.mxu0 %v560_v17 }
 0x290   :  { %536 = vmatpush3.bf16.msra.mxu0 %v398_v19 }
 0x293   :  { %538 = vmatmul.mubr.msk.bf16.vlgmr.msra.gmra.mxu0 %vm95_vm0, %v556_v20 }
 0x353   :  { %v452_v22 = vpop.f32.mrf.mxu0 }
 0x354   :  { %v453_v23 = vadd.f32 %v452_v22, %v403_v21 }
 0x355   :  { %v539_v24 = vpop.f32.mrf.mxu0 }
 0x356   :  { %459 = vst.msk [vmem:[%s722_s8] sm:$0xff] %vm242_vm2, %v453_v23 }
 0x357   :  { %v455_v26 = vpop.f32.mrf.mxu0 }
 0x358   :  { %v456_v17 = vadd.f32 %v455_v26, %v408_v25 }
 0x359   :  { %v540_v27 = vpop.f32.mrf.mxu0 }
 0x35a   :  { %460 = vst.msk [vmem:[%s722_s8 + $0x8] sm:$0xff] %vm242_vm2, %v456_v17 }

</bundles_post_ra>
